<compile_context>
chip_gen: v7x
topology: tpu7x:2x2x1
jax: 0.10.0
libtpu: 0.0.40
codegen_flags: <defaults>
</compile_context>

<pallas_src>
import functools

import jax
import jax.numpy as jnp
from jax.experimental import pallas as pl
from jax.experimental.pallas import tpu as pltpu


# ---------------------------------------------------------------------------
# Kernels
# ---------------------------------------------------------------------------


def _fused_gate_kernel(inv_n, x_ref, sal_ref, w1_ref, b1_ref, w2_ref, b2_ref,
                       o_ref):
    """Single-pass gate: channel attention + spatial sigmoid + fused apply.

    x_ref   : (bt, C, Np)  stream dtype
    sal_ref : (bt, 1, Np)  stream dtype (spatial-attention logits, pre-sigmoid)
    w1_ref  : (C, Cr)      b1_ref : (1, Cr)
    w2_ref  : (Cr, C)      b2_ref : (1, C)
    o_ref   : (bt, C, Np)
    """
    x = x_ref[...]                                               # stream dtype

    # --- channel attention, batched across all images in the slab ----------
    # Global average pool as an f32-accumulated lane reduction; padded lanes
    # are zero, so dividing by the true N is exact.
    pooled = jnp.sum(x, axis=-1, dtype=jnp.float32) * inv_n      # (bt, C)
    h = jnp.maximum(
        jnp.dot(pooled, w1_ref[...], preferred_element_type=jnp.float32)
        + b1_ref[...], 0.0)                                      # (bt, Cr)
    ca = jax.nn.sigmoid(
        jnp.dot(h, w2_ref[...], preferred_element_type=jnp.float32)
        + b2_ref[...])                                           # (bt, C)

    # --- spatial attention + fused apply ------------------------------------
    sa = jax.nn.sigmoid(sal_ref[...].astype(jnp.float32))        # (bt, 1, Np)
    o_ref[...] = (x.astype(jnp.float32) * ca[:, :, None] * sa
                  ).astype(o_ref.dtype)


def _apply_gate_kernel(x_ref, sal_ref, ca_ref, o_ref):
    """N-tiled elementwise apply (large-shape / v7x fallback path).

    x_ref: (1, C, tn), sal_ref: (1, 1, tn), ca_ref: (1, C, 1) f32.
    """
    sa = jax.nn.sigmoid(sal_ref[...].astype(jnp.float32))
    o_ref[...] = (x_ref[...].astype(jnp.float32) * ca_ref[...] * sa
                  ).astype(o_ref.dtype)


# ---------------------------------------------------------------------------
# Glue
# ---------------------------------------------------------------------------


def bilinear_align_corners(g, out_h, out_w):
    """F.interpolate(mode='bilinear', align_corners=True) for NCHW input."""
    B, C, H, W = g.shape
    if (H, W) == (out_h, out_w):
        return g
    ys = jnp.linspace(0.0, H - 1.0, out_h)
    xs = jnp.linspace(0.0, W - 1.0, out_w)
    y0 = jnp.floor(ys).astype(jnp.int32)
    x0 = jnp.floor(xs).astype(jnp.int32)
    y1 = jnp.minimum(y0 + 1, H - 1)
    x1 = jnp.minimum(x0 + 1, W - 1)
    wy = (ys - y0.astype(jnp.float32))[None, None, :, None]
    wx = (xs - x0.astype(jnp.float32))[None, None, None, :]
    g00 = g[:, :, y0][:, :, :, x0]
    g01 = g[:, :, y0][:, :, :, x1]
    g10 = g[:, :, y1][:, :, :, x0]
    g11 = g[:, :, y1][:, :, :, x1]
    top = g00 * (1.0 - wx) + g01 * wx
    bot = g10 * (1.0 - wx) + g11 * wx
    return top * (1.0 - wy) + bot * wy


def _vmem_capacity_bytes():
    """Physical VMEM per TensorCore; conservative fallback if query fails."""
    try:
        info = pltpu.get_tpu_info()
        cap = getattr(info, "vmem_capacity_bytes", None)
        if cap:
            return int(cap)
    except Exception:
        pass
    return 64 << 20  # v7x per-TC VMEM (smallest of current gens)


def _pick_lane_tile(np_total, c, itemsize, budget):
    """Largest multiple-of-128 divisor of np_total whose footprint fits budget."""
    lanes = np_total // 128
    best = 128
    for d in range(1, lanes + 1):
        if lanes % d:
            continue
        tn = d * 128
        foot = 2 * (2 * c * tn * itemsize + tn * itemsize) + c * tn * 4
        if foot <= budget:
            best = tn
    return best


@functools.partial(jax.jit, static_argnames=("force_tiled",))
def attention_gate(x_nchw, gating_nchw, params, force_tiled=False):
    """x_nchw: (B, C, H, W); gating_nchw: (B, Cg, Hg, Wg)."""
    B, C, H, W = x_nchw.shape
    N = H * W
    Np = ((N + 127) // 128) * 128          # lane-dense stores even for odd H*W
    itemsize = jnp.dtype(x_nchw.dtype).itemsize

    # Spatial-attention 1x1 conv at the LOW gating resolution, then bilinearly
    # upsample the single-channel logits map (exact: both ops are linear and
    # the interpolation weights sum to 1, so the bias commutes too).
    sal_low = (jnp.einsum('bchw,c->bhw', gating_nchw.astype(jnp.float32),
                          params["wsa"]) + params["bsa"])        # (B, Hg, Wg)
    sal = bilinear_align_corners(sal_low[:, None], H, W).reshape(B, 1, N)
    sal = sal.astype(x_nchw.dtype)         # stream dtype (bf16-friendly on v5e)

    x = x_nchw.reshape(B, C, N)            # NCHW -> (B, C, N): free, N on lanes
    if Np != N:
        pad = ((0, 0), (0, 0), (0, Np - N))
        x = jnp.pad(x, pad)
        sal = jnp.pad(sal, pad)

    w1, b1, w2, b2 = params["w1"], params["b1"], params["w2"], params["b2"]

    vmem_cap = _vmem_capacity_bytes()
    # Slab budget: ~28 MiB on v7x (64 MiB VMEM), ~56 MiB on v5e/v6e (128 MiB).
    slab_budget = int(min(0.45 * vmem_cap, 56 << 20))

    # Per-image VMEM footprint: double-buffered x/out/sal blocks + one f32 temp.
    per_img_vmem = 2 * (2 * C * Np * itemsize + Np * itemsize) + C * Np * 4

    use_tiled = force_tiled or per_img_vmem > slab_budget

    if not use_tiled:
        # ---- single fused pass: grid over fat batch slabs --------------------
        bt = max(1, min(B, slab_budget // max(per_img_vmem, 1)))
        if B >= 2:                         # keep >=2 grid steps for v7x's 2 TCs
            bt = min(bt, max(1, B // 2))
        while B % bt:
            bt -= 1

        footprint = bt * per_img_vmem + (1 << 20)   # + weights / small temps
        vmem_limit = int(max(32 << 20,
                             min(int(1.3 * footprint), int(0.75 * vmem_cap))))

        kernel = functools.partial(_fused_gate_kernel, 1.0 / float(N))
        out = pl.pallas_call(
            kernel,
            out_shape=jax.ShapeDtypeStruct((B, C, Np), x.dtype),
            grid_spec=pltpu.PrefetchScalarGridSpec(
                num_scalar_prefetch=0,
                grid=(B // bt,),
                in_specs=[
                    pl.BlockSpec((bt, C, Np), lambda i: (i, 0, 0)),   # x slab
                    pl.BlockSpec((bt, 1, Np), lambda i: (i, 0, 0)),   # sa logits
                    pl.BlockSpec(w1.shape, lambda i: (0, 0)),         # (C, Cr)
                    pl.BlockSpec(b1.shape, lambda i: (0, 0)),         # (1, Cr)
                    pl.BlockSpec(w2.shape, lambda i: (0, 0)),         # (Cr, C)
                    pl.BlockSpec(b2.shape, lambda i: (0, 0)),         # (1, C)
                ],
                out_specs=pl.BlockSpec((bt, C, Np), lambda i: (i, 0, 0)),
            ),
            compiler_params=pltpu.CompilerParams(
                dimension_semantics=("parallel",),
                vmem_limit_bytes=vmem_limit),
        )(x, sal, w1, b1, w2, b2)
    else:
        # ---- two-pass fallback (very large C*N, e.g. v7x 64 MiB VMEM) --------
        # Pass 1 (tiny, XLA): channel attention from the unpadded input.
        pooled = jnp.mean(x_nchw, axis=(2, 3), dtype=jnp.float32)     # (B, C)
        hmid = jnp.maximum(pooled @ w1 + b1, 0.0)                     # (B, Cr)
        ca = jax.nn.sigmoid(hmid @ w2 + b2)[:, :, None]               # (B, C, 1)

        # Pass 2 (Pallas): N-tiled elementwise apply, both grid axes parallel.
        tn = _pick_lane_tile(Np, C, itemsize, slab_budget)
        footprint = 2 * (2 * C * tn * itemsize + tn * itemsize) + C * tn * 4
        vmem_limit = int(max(32 << 20,
                             min(int(1.3 * footprint) + (1 << 20),
                                 int(0.75 * vmem_cap))))
        out = pl.pallas_call(
            _apply_gate_kernel,
            out_shape=jax.ShapeDtypeStruct((B, C, Np), x.dtype),
            grid_spec=pltpu.PrefetchScalarGridSpec(
                num_scalar_prefetch=0,
                grid=(B, Np // tn),
                in_specs=[
                    pl.BlockSpec((1, C, tn), lambda b, j: (b, 0, j)),
                    pl.BlockSpec((1, 1, tn), lambda b, j: (b, 0, j)),
                    pl.BlockSpec((1, C, 1), lambda b, j: (b, 0, 0)),
                ],
                out_specs=pl.BlockSpec((1, C, tn), lambda b, j: (b, 0, j)),
            ),
            compiler_params=pltpu.CompilerParams(
                dimension_semantics=("parallel", "parallel"),
                vmem_limit_bytes=vmem_limit),
        )(x, sal, ca)

    if Np != N:
        out = out[:, :, :N]
    return out.reshape(B, C, H, W)


# ---------------------------------------------------------------------------
# Parameters / reference
# ---------------------------------------------------------------------------


def init_params(key, in_channels, gating_channels, reduction=8):
    """Deterministic synthetic parameters, stored in row ("x @ W") orientation.

    Mapping from PyTorch:
      w1  = conv1.weight[:, :, 0, 0].T      (C, Cr)
      b1  = conv1.bias[None, :]             (1, Cr)
      w2  = conv2.weight[:, :, 0, 0].T      (Cr, C)
      b2  = conv2.bias[None, :]             (1, C)
      wsa = conv_sa.weight[0, :, 0, 0]      (Cg,)
      bsa = conv_sa.bias[0]                 ()
    """
    cr = max(1, in_channels // reduction)
    k1, k2, k3, k4, k5, k6 = jax.random.split(key, 6)
    return {
        "w1": jax.random.normal(k1, (in_channels, cr), jnp.float32) * 0.1,
        "b1": jax.random.normal(k2, (1, cr), jnp.float32) * 0.1,
        "w2": jax.random.normal(k3, (cr, in_channels), jnp.float32) * 0.1,
        "b2": jax.random.normal(k4, (1, in_channels), jnp.float32) * 0.1,
        "wsa": jax.random.normal(k5, (gating_channels,), jnp.float32) * 0.1,
        "bsa": jax.random.normal(k6, (), jnp.float32) * 0.1,
    }


def reference_attention_gate(x_nchw, gating_nchw, params):
    """Pure-JAX reference mirroring the PyTorch forward (interp THEN conv)."""
    B, C, H, W = x_nchw.shape
    pooled = jnp.mean(x_nchw, axis=(2, 3))                            # (B, C)
    h = jnp.maximum(pooled @ params["w1"] + params["b1"], 0.0)        # (B, Cr)
    ca = jax.nn.sigmoid(h @ params["w2"] + params["b2"])              # (B, C)
    xg = x_nchw * ca[:, :, None, None]
    gat = bilinear_align_corners(gating_nchw, H, W)
    sa = jax.nn.sigmoid(
        jnp.einsum('bchw,c->bhw', gat, params["wsa"]) + params["bsa"])  # (B,H,W)
    return xg * sa[:, None]


# ---------------------------------------------------------------------------
# Self-test
# ---------------------------------------------------------------------------


if __name__ == "__main__":
    kx, kg, kp = jax.random.split(jax.random.PRNGKey(0), 3)

    # Case 1: fused single-pass path, lane-aligned N (16*16 = 256).
    B, C, H, W = 2, 16, 16, 16            # in_channels=16, reduction=8 -> Cr=2
    Cg, Hg, Wg = 8, 8, 8                  # smaller gating -> exercises interp glue
    x = jax.random.normal(kx, (B, C, H, W), jnp.float32)
    gating = jax.random.normal(kg, (B, Cg, Hg, Wg), jnp.float32)
    params = init_params(kp, in_channels=C, gating_channels=Cg, reduction=8)

    out = jax.block_until_ready(attention_gate(x, gating, params))
    ref = reference_attention_gate(x, gating, params)
    assert out.shape == (B, C, H, W)
    assert jnp.allclose(out, ref, atol=2e-5, rtol=1e-5), "fused path mismatch"

    # Case 2: odd spatial size (N = 100, not a multiple of 128) -> lane padding.
    x2 = jax.random.normal(jax.random.fold_in(kx, 1), (B, C, 10, 10), jnp.float32)
    g2 = jax.random.normal(jax.random.fold_in(kg, 1), (B, Cg, 5, 5), jnp.float32)
    out2 = jax.block_until_ready(attention_gate(x2, g2, params))
    ref2 = reference_attention_gate(x2, g2, params)
    assert jnp.allclose(out2, ref2, atol=2e-5, rtol=1e-5), "padded path mismatch"

    # Case 3: force the two-pass N-tiled fallback (the v7x large-shape path).
    out3 = jax.block_until_ready(attention_gate(x, gating, params,
                                                force_tiled=True))
    assert jnp.allclose(out3, ref, atol=2e-5, rtol=1e-5), "tiled path mismatch"

    print("KERNEL_OK")
</pallas_src>

<mosaic_0001>
module attributes {stable_mosaic.version = 11 : i64} {
  func.func @_fused_gate_kernel(%arg0: i32, %arg1: memref<1x16x256xf32, #tpu.memory_space<vmem>>, %arg2: memref<1x1x256xf32, #tpu.memory_space<vmem>>, %arg3: memref<16x2xf32, #tpu.memory_space<vmem>>, %arg4: memref<1x2xf32, #tpu.memory_space<vmem>>, %arg5: memref<2x16xf32, #tpu.memory_space<vmem>>, %arg6: memref<1x16xf32, #tpu.memory_space<vmem>>, %arg7: memref<1x16x256xf32, #tpu.memory_space<vmem>>) attributes {dimension_semantics = [#tpu.dimension_semantics<parallel>], iteration_bounds = array<i64: 2>, scalar_prefetch = 0 : i64, scratch_operands = 0 : i64, tpu.core_type = #tpu.core_type<tc>, window_params = [{transform_indices = @transform_0, window_bounds = array<i64: 1, 16, 256>}, {transform_indices = @transform_1, window_bounds = array<i64: 1, 1, 256>}, {pipeline_mode = #tpu.pipeline_mode<synchronous>, transform_indices = @transform_2, window_bounds = array<i64: 16, 2>}, {pipeline_mode = #tpu.pipeline_mode<synchronous>, transform_indices = @transform_3, window_bounds = array<i64: 1, 2>}, {pipeline_mode = #tpu.pipeline_mode<synchronous>, transform_indices = @transform_4, window_bounds = array<i64: 2, 16>}, {pipeline_mode = #tpu.pipeline_mode<synchronous>, transform_indices = @transform_5, window_bounds = array<i64: 1, 16>}, {transform_indices = @transform_6, window_bounds = array<i64: 1, 16, 256>}]} {
    %c0 = arith.constant 0 : index
    %c0_0 = arith.constant 0 : index
    %c0_1 = arith.constant 0 : index
    %0 = vector.load %arg1[%c0, %c0_0, %c0_1] : memref<1x16x256xf32, #tpu.memory_space<vmem>>, vector<1x16x256xf32>
    %cst = arith.constant dense<0.000000e+00> : vector<1x16xf32>
    %1 = vector.multi_reduction <add>, %0, %cst [2] : vector<1x16x256xf32> to vector<1x16xf32>
    %cst_2 = arith.constant 3.906250e-03 : f32
    %2 = vector.broadcast %cst_2 : f32 to vector<1x16xf32>
    %3 = arith.mulf %1, %2 : vector<1x16xf32>
    %c0_3 = arith.constant 0 : index
    %c0_4 = arith.constant 0 : index
    %4 = vector.load %arg3[%c0_3, %c0_4] : memref<16x2xf32, #tpu.memory_space<vmem>>, vector<16x2xf32>
    %cst_5 = arith.constant dense<0.000000e+00> : vector<1x2xf32>
    %5 = tpu.matmul %3, %4, %cst_5 {dimension_numbers = #tpu.dot_dimension_numbers<[1], [0], [0], [1], [0, 0, 1, 1], [], []>} : vector<1x16xf32>, vector<16x2xf32>, vector<1x2xf32> -> vector<1x2xf32>
    %c0_6 = arith.constant 0 : index
    %c0_7 = arith.constant 0 : index
    %6 = vector.load %arg4[%c0_6, %c0_7] : memref<1x2xf32, #tpu.memory_space<vmem>>, vector<1x2xf32>
    %7 = arith.addf %5, %6 : vector<1x2xf32>
    %cst_8 = arith.constant 0.000000e+00 : f32
    %8 = vector.broadcast %cst_8 : f32 to vector<1x2xf32>
    %9 = arith.maximumf %7, %8 : vector<1x2xf32>
    %c0_9 = arith.constant 0 : index
    %c0_10 = arith.constant 0 : index
    %10 = vector.load %arg5[%c0_9, %c0_10] : memref<2x16xf32, #tpu.memory_space<vmem>>, vector<2x16xf32>
    %cst_11 = arith.constant dense<0.000000e+00> : vector<1x16xf32>
    %11 = tpu.matmul %9, %10, %cst_11 {dimension_numbers = #tpu.dot_dimension_numbers<[1], [0], [0], [1], [0, 0, 1, 1], [], []>} : vector<1x2xf32>, vector<2x16xf32>, vector<1x16xf32> -> vector<1x16xf32>
    %c0_12 = arith.constant 0 : index
    %c0_13 = arith.constant 0 : index
    %12 = vector.load %arg6[%c0_12, %c0_13] : memref<1x16xf32, #tpu.memory_space<vmem>>, vector<1x16xf32>
    %13 = arith.addf %11, %12 : vector<1x16xf32>
    %14 = arith.negf %13 : vector<1x16xf32>
    %15 = math.exp %14 : vector<1x16xf32>
    %cst_14 = arith.constant 1.000000e+00 : f32
    %16 = vector.broadcast %cst_14 : f32 to vector<1x16xf32>
    %17 = arith.addf %16, %15 : vector<1x16xf32>
    %18 = arith.divf %16, %17 : vector<1x16xf32>
    %c0_15 = arith.constant 0 : index
    %c0_16 = arith.constant 0 : index
    %c0_17 = arith.constant 0 : index
    %19 = vector.load %arg2[%c0_15, %c0_16, %c0_17] : memref<1x1x256xf32, #tpu.memory_space<vmem>>, vector<1x1x256xf32>
    %20 = arith.negf %19 : vector<1x1x256xf32>
    %21 = math.exp %20 : vector<1x1x256xf32>
    %cst_18 = arith.constant 1.000000e+00 : f32
    %22 = vector.broadcast %cst_18 : f32 to vector<1x1x256xf32>
    %23 = arith.addf %22, %21 : vector<1x1x256xf32>
    %24 = arith.divf %22, %23 : vector<1x1x256xf32>
    %25 = vector.shape_cast %18 : vector<1x16xf32> to vector<1x16x1xf32>
    %26 = vector.broadcast %25 : vector<1x16x1xf32> to vector<1x16x256xf32>
    %27 = arith.mulf %0, %26 : vector<1x16x256xf32>
    %28 = vector.broadcast %24 : vector<1x1x256xf32> to vector<1x16x256xf32>
    %29 = arith.mulf %27, %28 : vector<1x16x256xf32>
    %c0_19 = arith.constant 0 : index
    %c0_20 = arith.constant 0 : index
    %c0_21 = arith.constant 0 : index
    %30 = vector.load %arg7[%c0_19, %c0_20, %c0_21] : memref<1x16x256xf32, #tpu.memory_space<vmem>>, vector<1x16x256xf32>
    tpu.vector_store %arg7[%c0_19, %c0_20, %c0_21], %29 {strides = array<i32>} : memref<1x16x256xf32, #tpu.memory_space<vmem>>, vector<1x16x256xf32>,
    return
  }
  func.func @transform_0(%arg0: i32) -> (i32, i32, i32) {
    %c0_i32 = arith.constant 0 : i32
    %c0_i32_0 = arith.constant 0 : i32
    %c0_i32_1 = arith.constant 0 : i32
    return %arg0, %c0_i32, %c0_i32_0 : i32, i32, i32
  }
  func.func @transform_1(%arg0: i32) -> (i32, i32, i32) {
    %c0_i32 = arith.constant 0 : i32
    %c0_i32_0 = arith.constant 0 : i32
    %c0_i32_1 = arith.constant 0 : i32
    return %arg0, %c0_i32, %c0_i32_0 : i32, i32, i32
  }
  func.func @transform_2(%arg0: i32) -> (i32, i32) {
    %c0_i32 = arith.constant 0 : i32
    %c0_i32_0 = arith.constant 0 : i32
    %c0_i32_1 = arith.constant 0 : i32
    return %c0_i32, %c0_i32_0 : i32, i32
  }
  func.func @transform_3(%arg0: i32) -> (i32, i32) {
    %c0_i32 = arith.constant 0 : i32
    %c0_i32_0 = arith.constant 0 : i32
    %c0_i32_1 = arith.constant 0 : i32
    return %c0_i32, %c0_i32_0 : i32, i32
  }
  func.func @transform_4(%arg0: i32) -> (i32, i32) {
    %c0_i32 = arith.constant 0 : i32
    %c0_i32_0 = arith.constant 0 : i32
    %c0_i32_1 = arith.constant 0 : i32
    return %c0_i32, %c0_i32_0 : i32, i32
  }
  func.func @transform_5(%arg0: i32) -> (i32, i32) {
    %c0_i32 = arith.constant 0 : i32
    %c0_i32_0 = arith.constant 0 : i32
    %c0_i32_1 = arith.constant 0 : i32
    return %c0_i32, %c0_i32_0 : i32, i32
  }
  func.func @transform_6(%arg0: i32) -> (i32, i32, i32) {
    %c0_i32 = arith.constant 0 : i32
    %c0_i32_0 = arith.constant 0 : i32
    %c0_i32_1 = arith.constant 0 : i32
    return %arg0, %c0_i32, %c0_i32_0 : i32, i32, i32
  }
}

</mosaic_0001>

<bundles_post_ra>
// kernel: attention_gate.1
= control target key start
LH: loop header
LB: loop body
LE: loop exit
PB: predicated region body
PF: predicated region fallthrough
CT: control target
= control target key end

     0   :  { %s671_s21 = smov 0   ;;  %s730_s0 = inlined_call_operand.vmem [shape: f32[2,16,256], index: 0, kind: input, shape index: {}]   ;;  %s731_s1 = inlined_call_operand.vmem [shape: f32[2,1,256], index: 1, kind: input, shape index: {}]   ;;  %s732_s2 = inlined_call_operand.vmem [shape: f32[16,2], index: 2, kind: input, shape index: {}]   ;;  %s733_s3 = inlined_call_operand.vmem [shape: f32[1,2], index: 3, kind: input, shape index: {}]   ;;  %s734_s4 = inlined_call_operand.vmem [shape: f32[2,16], index: 4, kind: input, shape index: {}]   ;;  %s735_s5 = inlined_call_operand.vmem [shape: f32[1,16], index: 5, kind: input, shape index: {}]   ;;  %s736_s6 = inlined_call_operand.vmem [shape: f32[2,16,256], index: 6, kind: output, shape index: {}]  }
   0x1 LB: > { %s567_s22 = sadd.s32 4294967295, %s631_s21   ;;  %p571_p0 = scmp.ge.s32.totalorder %s631_s21, 1  ;;  %s631_s21 = sphi %s671_s21, %s16_s21  }
   0x2   : > { %p221_p1 = scmp.lt.s32.totalorder %s631_s21, 3 }
   0x4   : > { %p222_p2 = pnand %p571_p0, %p221_p1 }
   0x5   : > { %p255_p3 = scmp.lt.s32.totalorder (!%p222_p2), %s567_s22, 1  ;;  %v281_v6 = vld [vmem:[%s732_s2] sm:$0xff] (!%p222_p2)  ;;  %v282_v7 = vld [vmem:[%s732_s2 + $0x8] sm:$0xff] (!%p222_p2)  ;;  %v633_v9 = vmov (!%p222_p2), 0.0|0.0   ;;  %vm634_vm0 = vmmov (!%p222_p2), 0   ;;  %v635_v10 = vmov (!%p222_p2), 0.0   ;;  %v286_v11 = vlaneseq (!%p222_p2) }
   0x6   : > { %225 = sbr.rel (%p222_p2) target bundleno = 752 (0x2f0), region = 44  ;;  %v604_v8 = vpack.c.bf16 (!%p222_p2), %v282_v7, %v281_v6  ;;  %603 = vmatprep.subr.bf16.mxu0 (!%p222_p2), %v633_v9  ;;  %595 = vmatprep.mubr.msk.f32.mxu0 (!%p222_p2), %vm634_vm0, %v635_v10  ;;  %vm297_vm1 = vcmask (!%p222_p2), 130112   ;;  %vm299_vm2 = vcmask (!%p222_p2), 130048   ;;  %v373_v24 = vld [vmem:[%s734_s4] sm:$0x3] (!%p222_p2)  ;;  %vm379_vm3 = vcmask (!%p222_p2), 1041408  }
   0x7   : > { %598 = vmatprep.subr.mxu1 (!%p222_p2), %v635_v10  ;;  %600 = vmatprep.mubr.msk.f32.mxu1 (!%p222_p2), %vm634_vm0, %v635_v10  ;;  %v287_v12 = vand.u32 (!%p222_p2), 127, %v286_v11  ;;  %v289_v13 = vshrl.u32 (!%p222_p2), %v286_v11, 7  ;;  %v283_v25 = vld [vmem:[%s733_s3] sm:$0x1] (!%p222_p2)  ;;  %vm375_vm4 = vcmask (!%p222_p2), 15360  }
   0x8   : > { %605 = vmatpush3.bf16.msra.mxu0 (!%p222_p2), %v604_v8  ;;  %599 = vmatpush3.msk.msra.mxu1 (!%p222_p2), %vm379_vm3, %v373_v24  ;;  %v374_v30 = vld [vmem:[%s735_s5] sm:$0x1] (!%p222_p2) }
   0x9   : > { %v292_v14 = vadd.s32 (!%p222_p2), 4294967288, %v287_v12  ;;  %v290_v16 = vsub.s32 (!%p222_p2), %v287_v12, %v289_v13  ;;  %v468_v37 = vsub.s32 (!%p222_p2), 0, %v289_v13  ;;  %v488_v44 = vsub.s32 (!%p222_p2), 1, %v289_v13 }
   0xb   : > { %v295_v18 = vsub.s32 (!%p222_p2), %v292_v14, %v289_v13 }
   0xd   : > { %s738_s22 = smov (!%p255_p3, %s567_s22), 1 }
   0xe   : > { %s584_s23 = sshll.u32 %s738_s22, 5  ;;  %s574_s13 = sshll.u32 %s738_s22, 1 }
   0xf   : > { %s259_s26 = scalar_lea.vmem %s730_s0, %s584_s23  ;;  %s263_s16 = scalar_lea.vmem %s731_s1, %s574_s13 }
  0x10   : > { %v687_v0 = vld [vmem:[%s259_s26] sm:$0xff]  ;;  %v689_v1 = vld [vmem:[%s259_s26 + $0x8] sm:$0xff]  ;;  %v693_v3 = vld [vmem:[%s259_s26 + $0x10] sm:$0xff]  ;;  %s268_s19 = scalar_lea.vmem %s736_s6, %s584_s23 }
  0x11   : > { %v273_v2 = vadd.f32 %v689_v1, %v687_v0  ;;  %v695_v4 = vld [vmem:[%s259_s26 + $0x18] sm:$0xff]  ;;  %v459_v40 = vld [vmem:[%s263_s16] sm:$0x3] }
  0x12   : > { %v276_v5 = vadd.f32 %v695_v4, %v693_v3  ;;  %v581_v41 = vmul.f32 -1.442695, %v459_v40 }
  0x13   : > { %274 = vadd.xlane.f32.xlu0 %v273_v2 }
  0x17   : > { %277 = vadd.xlane.f32.xlu0 %v276_v5 }
  0xa0   : > { %v275_v15 = vpop.xlane.xlu0 %274 }
  0xa1   : > { %v279_v17 = vmul.f32 0.00390625, %v275_v15 }
  0xa3   : > { %v291_v21 = vrot.slane %v279_v17, %v290_v16 }
  0xa4   : > { %v278_v19 = vpop.xlane.xlu0 %277 }
  0xa5   : > { %v280_v20 = vmul.f32 0.00390625, %v278_v19 }
  0xa7   : > { %v296_v22 = vrot.slane %v280_v20, %v295_v18 }
  0xa9   : > { %v298_v23 = vsel %vm297_vm1, %v296_v22, %v291_v21 }
  0xaa   : > { %596 = vmatmul.mubr.msk.f32.vlgmr.msra.gmra.mrb[0].mxu0 %vm299_vm2, %v298_v23 }
 0x17d   : > { %v368_v26 = vpop.f32.mrb[0].mxu0 }
 0x17e   : > { %v369_v27 = vadd.f32 %v368_v26, %v283_v25  ;;  %v597_v28 = vpop.f32.mrb[1].mxu0 }
 0x180   : > { %v372_v29 = vmax.f32 %v369_v27, 0.0 }
 0x182   : > { %601 = vmatmul.mubr.msk.f32.vlgmr.msra.gmra.mrb[0].mxu1 %vm375_vm4, %v372_v29 }
 0x255   : > { %v449_v31 = vpop.f32.mrb[0].mxu1 }
 0x256   : > { %v450_v32 = vadd.f32 %v449_v31, %v374_v30  ;;  %v602_v33 = vpop.f32.mrb[1].mxu1 }
 0x258   : > { %v580_v34 = vmul.f32 -1.442695, %v450_v32 }
 0x25a   : > { %617 = vpow2.f32 %v580_v34 }
 0x264   : > { %v618_v35 = vpop.eup %617 }
 0x265   : > { %v456_v36 = vadd.f32 1.0, %v618_v35 }
 0x267   : > { %619 = vrcp.f32 %v456_v36 }
 0x268   : > { %621 = vpow2.f32 %v581_v41 }
 0x271   : > { %v620_v38 = vpop.eup %619 }
 0x272   : > { %v469_v39 = vrot.slane %v620_v38, %v468_v37  ;;  %v622_v42 = vpop.eup %621 }
 0x273   : > { %v463_v43 = vadd.f32 1.0, %v622_v42 }
 0x274   : > { %471 = vbcast.lane.b32.xlu1 %v469_v39, 256 }
 0x275   : > { %623 = vrcp.f32 %v463_v43 }
 0x278   : > { %475 = vbcast.lane.b32.xlu1 %v469_v39, 264 }
 0x27f   : > { %v624_v45 = vpop.eup %623 }
 0x280   : > { %v485_v46 = vrot.slane %v624_v45, %v468_v37  ;;  %v489_v47 = vrot.slane %v624_v45, %v488_v44 }
 0x2e6   : > { %v472_v48 = vpop.permute.xlu1 %471 }
 0x2e7   : > { %v477_v49 = vmul.f32 %v472_v48, %v687_v0  ;;  %v478_v50 = vmul.f32 %v472_v48, %v689_v1 }
 0x2e9   : > { %v492_v51 = vmul.f32 %v485_v46, %v477_v49  ;;  %v493_v52 = vmul.f32 %v489_v47, %v478_v50 }
 0x2ea   : > { %v476_v53 = vpop.permute.xlu1 %475 }
 0x2eb   : > { %496 = vst [vmem:[%s268_s19] sm:$0xff] %v492_v51  ;;  %497 = vst [vmem:[%s268_s19 + $0x8] sm:$0xff] %v493_v52  ;;  %v479_v54 = vmul.f32 %v476_v53, %v693_v3  ;;  %v480_v55 = vmul.f32 %v476_v53, %v695_v4 }
 0x2ed   : > { %v494_v56 = vmul.f32 %v485_v46, %v479_v54  ;;  %v495_v57 = vmul.f32 %v489_v47, %v480_v55 }
 0x2ef   : > { %498 = vst [vmem:[%s268_s19 + $0x10] sm:$0xff] %v494_v56  ;;  %499 = vst [vmem:[%s268_s19 + $0x18] sm:$0xff] %v495_v57 }
 0x2f0 PF: > { %s16_s21 = sadd.s32 1, %s631_s21  }
 0x2f1   : > { %p13_p4 = scmp.ge.s32.totalorder %s16_s21, 4  }
 0x2f3   :  { %15 = sbr.rel (!%p13_p4) target bundleno = 1 (0x1), region = 77 }

</bundles_post_ra>
